<compile_context>
chip_gen: v5e
topology: v5e:2x2
jax: 0.10.0
libtpu: 0.0.40
codegen_flags: <defaults>
</compile_context>

<pallas_src>
import jax
import jax.numpy as jnp
from jax.experimental import pallas as pl
from jax.experimental.pallas import tpu as pltpu


def _scalarization_kernel(w_ref, init_ref, final_ref, out_ref):
    # w_ref, init_ref, final_ref: 1-D f32[T] in SMEM.
    # out_ref: (1,) f32 in SMEM (scalar result).
    T = w_ref.shape[0]
    initial_acc = jnp.float32(0.0)
    final_acc = jnp.float32(0.0)
    # Static (trace-time) unroll: T is tiny, this is ~3T scalar ops on the
    # scalar unit -- no vector loads, no XLU reduce, no MXU.
    for t in range(T):
        initial_acc = initial_acc + w_ref[t] * init_ref[t]
        final_acc = final_acc + w_ref[t] * final_ref[t]
    out_ref[0] = initial_acc + final_acc


@jax.jit
def scalarization(weights, initial_losses, final_losses):
    """weights, initial_losses, final_losses: 1-D arrays of length T (num tasks).

    Returns a scalar f32: sum(w * initial) + sum(w * final).
    """
    T = weights.shape[0]
    assert initial_losses.shape[0] == T and final_losses.shape[0] == T, (
        "task-count mismatch between weights / initial / final losses"
    )

    # Force f32 accumulation regardless of caller dtype (fuses under jit).
    w = weights.astype(jnp.float32)
    li = initial_losses.astype(jnp.float32)
    lf = final_losses.astype(jnp.float32)

    out = pl.pallas_call(
        _scalarization_kernel,
        out_shape=jax.ShapeDtypeStruct((1,), jnp.float32),
        # Whole arrays straight into SMEM: no blocked pipeline, no VMEM tiles.
        in_specs=[
            pl.BlockSpec(memory_space=pltpu.SMEM),
            pl.BlockSpec(memory_space=pltpu.SMEM),
            pl.BlockSpec(memory_space=pltpu.SMEM),
        ],
        out_specs=pl.BlockSpec(memory_space=pltpu.SMEM),
    )(w, li, lf)
    return out[0]


class Scalarization:
    """Thin wrapper mirroring the PyTorch module: dict-of-scalars interface."""

    def __init__(self, tasks, loss_weights):
        self.tasks = list(tasks)
        self.weights = jnp.asarray(
            [loss_weights[t] for t in self.tasks], dtype=jnp.float32
        )

    def __call__(self, losses):
        initial = jnp.asarray(
            [losses["initial"][t] for t in self.tasks], dtype=jnp.float32
        )
        final = jnp.asarray(
            [losses["final"][t] for t in self.tasks], dtype=jnp.float32
        )
        return scalarization(self.weights, initial, final)


if __name__ == "__main__":
    # Synthetic setup consistent with the module: a list of task names, a
    # per-task loss weight, and scalar per-task losses for 'initial' / 'final'.
    tasks = ["semseg", "depth", "normals", "edge"]  # T = 4
    T = len(tasks)

    key = jax.random.PRNGKey(0)
    k_w, k_i, k_f = jax.random.split(key, 3)

    weights = jax.random.uniform(k_w, (T,), dtype=jnp.float32, minval=0.1, maxval=2.0)
    initial_losses = jax.random.uniform(k_i, (T,), dtype=jnp.float32)
    final_losses = jax.random.uniform(k_f, (T,), dtype=jnp.float32)

    # Exercise the module-style (dict) interface.
    module = Scalarization(tasks, {t: weights[i] for i, t in enumerate(tasks)})
    losses = {
        "initial": {t: initial_losses[i] for i, t in enumerate(tasks)},
        "final": {t: final_losses[i] for i, t in enumerate(tasks)},
    }
    total = module(losses)
    total = jax.block_until_ready(total)

    # Reference check (plain JAX, mirrors the PyTorch forward exactly).
    ref = jnp.sum(weights * initial_losses) + jnp.sum(weights * final_losses)
    assert jnp.allclose(total, ref, rtol=1e-6, atol=1e-6), (total, ref)

    print("KERNEL_OK")
</pallas_src>

<mosaic_0001>
module attributes {stable_mosaic.version = 11 : i64} {
  func.func @_scalarization_kernel(%arg0: memref<4xf32, #tpu.memory_space<smem>>, %arg1: memref<4xf32, #tpu.memory_space<smem>>, %arg2: memref<4xf32, #tpu.memory_space<smem>>, %arg3: memref<1xf32, #tpu.memory_space<smem>>) attributes {dimension_semantics = [], scalar_prefetch = 0 : i64, scratch_operands = 0 : i64, tpu.core_type = #tpu.core_type<tc>} {
    %c0 = arith.constant 0 : index
    %0 = memref.load %arg0[%c0] : memref<4xf32, #tpu.memory_space<smem>>
    %c0_0 = arith.constant 0 : index
    %1 = memref.load %arg1[%c0_0] : memref<4xf32, #tpu.memory_space<smem>>
    %2 = arith.mulf %0, %1 : f32
    %cst = arith.constant 0.000000e+00 : f32
    %3 = arith.addf %cst, %2 : f32
    %c0_1 = arith.constant 0 : index
    %4 = memref.load %arg0[%c0_1] : memref<4xf32, #tpu.memory_space<smem>>
    %c0_2 = arith.constant 0 : index
    %5 = memref.load %arg2[%c0_2] : memref<4xf32, #tpu.memory_space<smem>>
    %6 = arith.mulf %4, %5 : f32
    %cst_3 = arith.constant 0.000000e+00 : f32
    %7 = arith.addf %cst_3, %6 : f32
    %c1 = arith.constant 1 : index
    %8 = memref.load %arg0[%c1] : memref<4xf32, #tpu.memory_space<smem>>
    %c1_4 = arith.constant 1 : index
    %9 = memref.load %arg1[%c1_4] : memref<4xf32, #tpu.memory_space<smem>>
    %10 = arith.mulf %8, %9 : f32
    %11 = arith.addf %3, %10 : f32
    %c1_5 = arith.constant 1 : index
    %12 = memref.load %arg0[%c1_5] : memref<4xf32, #tpu.memory_space<smem>>
    %c1_6 = arith.constant 1 : index
    %13 = memref.load %arg2[%c1_6] : memref<4xf32, #tpu.memory_space<smem>>
    %14 = arith.mulf %12, %13 : f32
    %15 = arith.addf %7, %14 : f32
    %c2 = arith.constant 2 : index
    %16 = memref.load %arg0[%c2] : memref<4xf32, #tpu.memory_space<smem>>
    %c2_7 = arith.constant 2 : index
    %17 = memref.load %arg1[%c2_7] : memref<4xf32, #tpu.memory_space<smem>>
    %18 = arith.mulf %16, %17 : f32
    %19 = arith.addf %11, %18 : f32
    %c2_8 = arith.constant 2 : index
    %20 = memref.load %arg0[%c2_8] : memref<4xf32, #tpu.memory_space<smem>>
    %c2_9 = arith.constant 2 : index
    %21 = memref.load %arg2[%c2_9] : memref<4xf32, #tpu.memory_space<smem>>
    %22 = arith.mulf %20, %21 : f32
    %23 = arith.addf %15, %22 : f32
    %c3 = arith.constant 3 : index
    %24 = memref.load %arg0[%c3] : memref<4xf32, #tpu.memory_space<smem>>
    %c3_10 = arith.constant 3 : index
    %25 = memref.load %arg1[%c3_10] : memref<4xf32, #tpu.memory_space<smem>>
    %26 = arith.mulf %24, %25 : f32
    %27 = arith.addf %19, %26 : f32
    %c3_11 = arith.constant 3 : index
    %28 = memref.load %arg0[%c3_11] : memref<4xf32, #tpu.memory_space<smem>>
    %c3_12 = arith.constant 3 : index
    %29 = memref.load %arg2[%c3_12] : memref<4xf32, #tpu.memory_space<smem>>
    %30 = arith.mulf %28, %29 : f32
    %31 = arith.addf %23, %30 : f32
    %32 = arith.addf %27, %31 : f32
    %c0_13 = arith.constant 0 : index
    %33 = memref.load %arg3[%c0_13] : memref<1xf32, #tpu.memory_space<smem>>
    memref.store %32, %arg3[%c0_13] : memref<1xf32, #tpu.memory_space<smem>>
    return
  }
}

</mosaic_0001>

<bundles_post_ra>
// kernel: scalarization.1
= control target key start
LH: loop header
LB: loop body
LE: loop exit
PB: predicated region body
PF: predicated region fallthrough
CT: control target
= control target key end

     0   :  { %8 = vsyncpa [#allocation3], 0  ;;  %s206_s0 = inlined_call_operand.hbm [shape: f32[4], index: 0, kind: input, shape index: {}]   ;;  %s207_s1 = inlined_call_operand.hbm [shape: f32[4], index: 1, kind: input, shape index: {}]   ;;  %s208_s2 = inlined_call_operand.vmem [shape: f32[4], index: 2, kind: input, shape index: {}]   ;;  %s209_s3 = inlined_call_operand.hbm [shape: f32[1], index: 3, kind: output, shape index: {}]  }
   0x1   :  { %9 = vsyncpa [#allocation7], 0 }
   0x2   :  { %10 = vsyncpa [#allocation5], 0 }
   0x3   :  { %11 = vsyncpa [#allocation4], 0  ;;  %s17_s14 = sshll.u32 %s206_s0, 4  ;;  %s26_s17 = sshll.u32 %s207_s1, 4  ;;  %s18_s14 = int_to_ptr.hbm [resolvable:$true] %s17_s14  ;;  %s27_s17 = int_to_ptr.hbm [resolvable:$true] %s26_s17 }
   0x4   :  { %s170_s18 = smov [#allocation2]   ;;  %s171_s19 = smov [#allocation6]  }
   0x5   :  { %20 = dma.hbm_to_smem %s18_s14, 16, %s170_s18, [#allocation3]  }
   0x6   :  { %29 = dma.hbm_to_smem %s27_s17, 16, %s171_s19, [#allocation7]  }
   0x7   :  { %s35_s22 = sshll.u32 %s208_s2, 4  ;;  %s172_s23 = smov [#allocation8]   ;;  %s36_s22 = int_to_ptr.vmem [resolvable:$true] %s35_s22 }
   0x8   :  { %38 = dma.vmem_to_smem %s36_s22, 16, %s172_s23, [#allocation5]  }
   0x9   :  { %162 = dma.done.wait [#allocation3], 16  }
   0xa   :  { %163 = vsyncadd [#allocation3], 4294967280 }
   0xb   :  { %164 = dma.done.wait [#allocation7], 16  }
   0xc   :  { %165 = vsyncadd [#allocation7], 4294967280 }
   0xd   :  { %166 = dma.done.wait [#allocation5], 16  }
   0xe   :  { %167 = vsyncadd [#allocation5], 4294967280 }
   0xf   :  { %51 = sfence }
  0x10   :  { %s52_s0 = sld [smem:[#allocation2]]  ;;  %s88_s20 = sshll.u32 %s209_s3, 4  ;;  %s89_s20 = int_to_ptr.hbm [resolvable:$true] %s88_s20 }
  0x11   :  { %s53_s1 = sld [smem:[#allocation6]] }
  0x12   :  { %s56_s24 = sld [smem:[#allocation8]] }
  0x13   :  { %s101_s25 = sld [smem:[#allocation2 + $0x1]] }
  0x14   :  { %s102_s26 = sld [smem:[#allocation6 + $0x1]] }
  0x15   :  { %s103_s27 = sld [smem:[#allocation8 + $0x1]] }
  0x16   :  { %s104_s28 = sld [smem:[#allocation2 + $0x2]] }
  0x17   :  { %s105_s29 = sld [smem:[#allocation6 + $0x2]]  ;;  %s54_s30 = smul.f32 %s53_s1, %s52_s0 }
  0x18   :  { %s106_s2 = sld [smem:[#allocation8 + $0x2]]  ;;  %s57_s4 = smul.f32 %s56_s24, %s52_s0 }
  0x19   :  { %s107_s5 = sld [smem:[#allocation2 + $0x3]]  ;;  %s173_s0 = smov [#allocation9]  }
  0x1a   :  { %s61_s6 = smul.f32 %s102_s26, %s101_s25  ;;  %s108_s7 = sld [smem:[#allocation6 + $0x3]] }
  0x1b   :  { %s64_s8 = smul.f32 %s103_s27, %s101_s25  ;;  %s109_s9 = sld [smem:[#allocation8 + $0x3]] }
  0x1c   :  { %s62_s10 = sadd.f32 %s61_s6, %s54_s30 }
  0x1d   :  { %s65_s11 = sadd.f32 %s64_s8, %s57_s4  ;;  %s68_s12 = smul.f32 %s105_s29, %s104_s28 }
  0x1e   :  { %s71_s13 = smul.f32 %s106_s2, %s104_s28 }
  0x1f   :  { %s69_s14 = sadd.f32 %s68_s12, %s62_s10 }
  0x20   :  { %s72_s15 = sadd.f32 %s71_s13, %s65_s11  ;;  %s75_s16 = smul.f32 %s108_s7, %s107_s5 }
  0x21   :  { %s78_s17 = smul.f32 %s109_s9, %s107_s5 }
  0x22   :  { %s76_s21 = sadd.f32 %s75_s16, %s69_s14 }
  0x23   :  { %s79_s22 = sadd.f32 %s78_s17, %s72_s15 }
  0x25   :  { %s80_s23 = sadd.f32 %s79_s22, %s76_s21 }
  0x27   :  { %82 = sst [smem:[#allocation9]] %s80_s23 }
  0x28   :  { %91 = dma.smem_to_hbm %s173_s0, 16, %s89_s20, [#allocation4]  }
  0x29   :  { %168 = dma.done.wait [#allocation4], 16  }
  0x2a   :  { %169 = vsyncadd [#allocation4], 4294967280 }
  0x2b   :  { %96 = sfence }
  0x2c   :  { %97 = vsyncpa [#allocation3], 1 }
  0x2d   :  { %98 = vsyncpa [#allocation7], 1 }
  0x2e   :  { %99 = vsyncpa [#allocation4], 1 }
  0x2f   :  { %100 = vsyncpa [#allocation5], 1 }

</bundles_post_ra>
